<compile_context>
chip_gen: v6e
topology: v6e:2x2x1
jax: 0.10.0
libtpu: 0.0.40
codegen_flags: <defaults>
</compile_context>

<pallas_src>
import functools

import jax
import jax.numpy as jnp
from jax.experimental import pallas as pl
from jax.experimental.pallas import tpu as pltpu

_LANE = 128      # lane width: last dim padded to multiples of this
_SUBLANE = 8     # sublane width: batch padded to multiples of this


def _round_up(n, m):
    return ((n + m - 1) // m) * m


def _fused_mlp_kernel(x_ref, *refs, n_layers):
    """Fused MLP: (Linear -> ReLU) x (n_layers - 1) -> Linear, one kernel body.

    x_ref: (Bp, INp) f32
    refs : w0 (INp, H0p) bf16, b0 (1, H0p) f32, w1, b1, ..., o_ref (Bp, OUTp) f32
    Padded rows/cols are zero, so they are inert in the math.
    """
    o_ref = refs[-1]
    wb_refs = refs[:-1]

    h = x_ref[...].astype(jnp.bfloat16)          # bf16 feed for the MXU
    for i in range(n_layers):
        w = wb_refs[2 * i][...]                  # (INp, OUTp) bf16
        b = wb_refs[2 * i + 1][...]              # (1, OUTp)   f32
        acc = jnp.dot(h, w, preferred_element_type=jnp.float32)  # MXU, f32 acc
        acc = acc + b                            # f32 epilogue
        if i < n_layers - 1:
            acc = jnp.maximum(acc, 0.0)          # ReLU (hidden layers only)
            h = acc.astype(jnp.bfloat16)         # bf16 feed for next MXU pass
        else:
            o_ref[...] = acc                     # o_ref is f32; no cast needed


def init_mlp_params(key, input_size, hidden_sizes, output_size):
    """nn.Linear-style init U(-1/sqrt(in), 1/sqrt(in)), stored padded.

    Weights: (in_pad, out_pad) bf16 (pre-transposed vs. PyTorch's (out, in)).
    Biases : (1, out_pad) f32.  Padding entries are zero.
    """
    sizes = [input_size] + list(hidden_sizes) + [output_size]
    params = []
    prev_pad = _round_up(input_size, _LANE)
    for in_size, out_size in zip(sizes[:-1], sizes[1:]):
        key, wk, bk = jax.random.split(key, 3)
        bound = 1.0 / (in_size ** 0.5)
        w = jax.random.uniform(wk, (in_size, out_size), jnp.float32, -bound, bound)
        b = jax.random.uniform(bk, (out_size,), jnp.float32, -bound, bound)
        out_pad = _round_up(out_size, _LANE)
        w_p = jnp.zeros((prev_pad, out_pad), jnp.float32).at[:in_size, :out_size].set(w)
        b_p = jnp.zeros((1, out_pad), jnp.float32).at[0, :out_size].set(b)
        params.append((w_p.astype(jnp.bfloat16), b_p))
        prev_pad = out_pad
    return params


@functools.partial(jax.jit, static_argnums=(2, 3))
def mlp_forward(x, params, input_size, output_size):
    """Forward pass of the MLP using one fused Pallas kernel."""
    batch = x.shape[0]
    n_layers = len(params)
    in_pad = params[0][0].shape[0]
    out_pad = params[-1][0].shape[1]
    batch_pad = _round_up(max(batch, _SUBLANE), _SUBLANE)

    # Zero-pad activations to (batch_pad, in_pad); zero rows/cols are inert.
    x_p = jnp.zeros((batch_pad, in_pad), jnp.float32).at[:batch, :input_size].set(x)

    flat = []
    for w, b in params:
        flat.extend((w, b))

    kernel = functools.partial(_fused_mlp_kernel, n_layers=n_layers)
    out_p = pl.pallas_call(
        kernel,
        out_shape=jax.ShapeDtypeStruct((batch_pad, out_pad), jnp.float32),
        in_specs=[pl.BlockSpec(memory_space=pltpu.MemorySpace.VMEM)]
        * (1 + 2 * n_layers),
        out_specs=pl.BlockSpec(memory_space=pltpu.MemorySpace.VMEM),
    )(x_p, *flat)

    return out_p[:batch, :output_size]


if __name__ == "__main__":
    # Small shapes consistent with the module: flat feature inputs.
    batch = 8
    input_size = 32
    hidden_sizes = [64, 64]
    output_size = 10

    key = jax.random.PRNGKey(0)
    key, xk = jax.random.split(key)
    x = jax.random.normal(xk, (batch, input_size), jnp.float32)

    params = init_mlp_params(key, input_size, hidden_sizes, output_size)

    out = mlp_forward(x, params, input_size, output_size)
    out = jax.block_until_ready(out)

    # Pure-JAX reference with the exact same (padded, bf16-weight) math.
    in_pad = params[0][0].shape[0]
    batch_pad = _round_up(max(batch, _SUBLANE), _SUBLANE)
    x_p = jnp.zeros((batch_pad, in_pad), jnp.float32).at[:batch, :input_size].set(x)
    h = x_p.astype(jnp.bfloat16)
    acc = None
    for i, (w_p, b_p) in enumerate(params):
        acc = jnp.dot(h, w_p, preferred_element_type=jnp.float32) + b_p
        if i < len(params) - 1:
            acc = jnp.maximum(acc, 0.0)
            h = acc.astype(jnp.bfloat16)
    ref = acc[:batch, :output_size]

    assert out.shape == (batch, output_size)
    assert jnp.allclose(out, ref, atol=1e-3, rtol=1e-3)

    print("KERNEL_OK")
</pallas_src>

<mosaic_0001>
module attributes {stable_mosaic.version = 11 : i64} {
  func.func @_fused_mlp_kernel(%arg0: memref<8x128xf32, #tpu.memory_space<vmem>>, %arg1: memref<128x128xbf16, #tpu.memory_space<vmem>>, %arg2: memref<1x128xf32, #tpu.memory_space<vmem>>, %arg3: memref<128x128xbf16, #tpu.memory_space<vmem>>, %arg4: memref<1x128xf32, #tpu.memory_space<vmem>>, %arg5: memref<128x128xbf16, #tpu.memory_space<vmem>>, %arg6: memref<1x128xf32, #tpu.memory_space<vmem>>, %arg7: memref<8x128xf32, #tpu.memory_space<vmem>>) attributes {dimension_semantics = [], scalar_prefetch = 0 : i64, scratch_operands = 0 : i64, tpu.core_type = #tpu.core_type<tc>} {
    %c0 = arith.constant 0 : index
    %c0_0 = arith.constant 0 : index
    %0 = vector.load %arg0[%c0, %c0_0] : memref<8x128xf32, #tpu.memory_space<vmem>>, vector<8x128xf32>
    %1 = arith.truncf %0 : vector<8x128xf32> to vector<8x128xbf16>
    %c0_1 = arith.constant 0 : index
    %c0_2 = arith.constant 0 : index
    %2 = vector.load %arg1[%c0_1, %c0_2] : memref<128x128xbf16, #tpu.memory_space<vmem>>, vector<128x128xbf16>
    %c0_3 = arith.constant 0 : index
    %c0_4 = arith.constant 0 : index
    %3 = vector.load %arg2[%c0_3, %c0_4] : memref<1x128xf32, #tpu.memory_space<vmem>>, vector<1x128xf32>
    %cst = arith.constant dense<0.000000e+00> : vector<8x128xf32>
    %4 = tpu.matmul %1, %2, %cst {dimension_numbers = #tpu.dot_dimension_numbers<[1], [0], [0], [1], [0, 0, 1, 1], [], []>} : vector<8x128xbf16>, vector<128x128xbf16>, vector<8x128xf32> -> vector<8x128xf32>
    %5 = vector.broadcast %3 : vector<1x128xf32> to vector<8x128xf32>
    %6 = arith.addf %4, %5 : vector<8x128xf32>
    %cst_5 = arith.constant 0.000000e+00 : f32
    %7 = vector.broadcast %cst_5 : f32 to vector<8x128xf32>
    %8 = arith.maximumf %6, %7 : vector<8x128xf32>
    %9 = arith.truncf %8 : vector<8x128xf32> to vector<8x128xbf16>
    %c0_6 = arith.constant 0 : index
    %c0_7 = arith.constant 0 : index
    %10 = vector.load %arg3[%c0_6, %c0_7] : memref<128x128xbf16, #tpu.memory_space<vmem>>, vector<128x128xbf16>
    %c0_8 = arith.constant 0 : index
    %c0_9 = arith.constant 0 : index
    %11 = vector.load %arg4[%c0_8, %c0_9] : memref<1x128xf32, #tpu.memory_space<vmem>>, vector<1x128xf32>
    %cst_10 = arith.constant dense<0.000000e+00> : vector<8x128xf32>
    %12 = tpu.matmul %9, %10, %cst_10 {dimension_numbers = #tpu.dot_dimension_numbers<[1], [0], [0], [1], [0, 0, 1, 1], [], []>} : vector<8x128xbf16>, vector<128x128xbf16>, vector<8x128xf32> -> vector<8x128xf32>
    %13 = vector.broadcast %11 : vector<1x128xf32> to vector<8x128xf32>
    %14 = arith.addf %12, %13 : vector<8x128xf32>
    %cst_11 = arith.constant 0.000000e+00 : f32
    %15 = vector.broadcast %cst_11 : f32 to vector<8x128xf32>
    %16 = arith.maximumf %14, %15 : vector<8x128xf32>
    %17 = arith.truncf %16 : vector<8x128xf32> to vector<8x128xbf16>
    %c0_12 = arith.constant 0 : index
    %c0_13 = arith.constant 0 : index
    %18 = vector.load %arg5[%c0_12, %c0_13] : memref<128x128xbf16, #tpu.memory_space<vmem>>, vector<128x128xbf16>
    %c0_14 = arith.constant 0 : index
    %c0_15 = arith.constant 0 : index
    %19 = vector.load %arg6[%c0_14, %c0_15] : memref<1x128xf32, #tpu.memory_space<vmem>>, vector<1x128xf32>
    %cst_16 = arith.constant dense<0.000000e+00> : vector<8x128xf32>
    %20 = tpu.matmul %17, %18, %cst_16 {dimension_numbers = #tpu.dot_dimension_numbers<[1], [0], [0], [1], [0, 0, 1, 1], [], []>} : vector<8x128xbf16>, vector<128x128xbf16>, vector<8x128xf32> -> vector<8x128xf32>
    %21 = vector.broadcast %19 : vector<1x128xf32> to vector<8x128xf32>
    %22 = arith.addf %20, %21 : vector<8x128xf32>
    %c0_17 = arith.constant 0 : index
    %c0_18 = arith.constant 0 : index
    %23 = vector.load %arg7[%c0_17, %c0_18] : memref<8x128xf32, #tpu.memory_space<vmem>>, vector<8x128xf32>
    tpu.vector_store %arg7[%c0_17, %c0_18], %22 {strides = array<i32>} : memref<8x128xf32, #tpu.memory_space<vmem>>, vector<8x128xf32>,
    return
  }
}

</mosaic_0001>

<bundles_post_ra>
// kernel: mlp_forward.1
= control target key start
LH: loop header
LB: loop body
LE: loop exit
PB: predicated region body
PF: predicated region fallthrough
CT: control target
= control target key end

     0   :  { %12 = vsyncpa [#allocation3], 0  ;;  %s759_s0 = inlined_call_operand.vmem [shape: f32[8,128], index: 0, kind: input, shape index: {}]   ;;  %s760_s1 = inlined_call_operand.hbm [shape: bf16[128,128], index: 1, kind: input, shape index: {}]   ;;  %s761_s2 = inlined_call_operand.vmem [shape: f32[1,128], index: 2, kind: input, shape index: {}]   ;;  %s762_s3 = inlined_call_operand.hbm [shape: bf16[128,128], index: 3, kind: input, shape index: {}]   ;;  %s763_s4 = inlined_call_operand.vmem [shape: f32[1,128], index: 4, kind: input, shape index: {}]   ;;  %s764_s5 = inlined_call_operand.hbm [shape: bf16[128,128], index: 5, kind: input, shape index: {}]   ;;  %s765_s6 = inlined_call_operand.vmem [shape: f32[1,128], index: 6, kind: input, shape index: {}]   ;;  %s766_s7 = inlined_call_operand.hbm [shape: f32[8,128], index: 7, kind: output, shape index: {}]  }
   0x1   :  { %13 = vsyncpa [#allocation6], 0 }
   0x2   :  { %14 = vsyncpa [#allocation4], 0  ;;  %s657_s24 = smov [#allocation5]   ;;  %s658_s26 = smov [#allocation2]  }
   0x3   :  { %s36_s25 = sshll.u32 %s657_s24, 4  ;;  %s22_s27 = sshll.u32 %s658_s26, 4  ;;  %s37_s25 = int_to_ptr.vmem [resolvable:$true] %s36_s25  ;;  %s23_s27 = int_to_ptr.vmem [resolvable:$true] %s22_s27 }
   0x4   :  { %s579_s28 = scalar_lea.vmem %s37_s25, 1024  ;;  %p584_p1 = scmp.lt.s32.totalorder %s37_s25, %s37_s25 }
   0x5   :  { %p580_p0 = scmp.ne.s32.totalorder %s37_s25, %s579_s28  ;;  %p585_p2 = scmp.lt.s32.totalorder %s579_s28, %s579_s28 }
   0x7   :  { %p586_p3 = por %p585_p2, %p584_p1 }
   0x9   :  { %p587_p4 = pnand %p586_p3, %p580_p0 }
   0xb   :  { %590 = shalt.err (!%p587_p4)
}
   0xc   :  { %s659_s29 = smov 64   ;;  %s660_s30 = smov 4  }
   0xd   :  { %42 = dma.hbm_to_vmem [thread:$0]  %s762_s3, 1024, %s37_s25, [#allocation6], %s659_s29, %s659_s29, %s660_s30  }
   0xe   :  { %s599_s10 = scalar_lea.vmem %s23_s27, 1024  ;;  %p604_p6 = scmp.lt.s32.totalorder %s23_s27, %s23_s27 }
   0xf   :  { %p600_p5 = scmp.ne.s32.totalorder %s23_s27, %s599_s10  ;;  %p605_p7 = scmp.lt.s32.totalorder %s599_s10, %s599_s10 }
  0x11   :  { %p606_p8 = por %p605_p7, %p604_p6 }
  0x13   :  { %p607_p9 = pnand %p606_p8, %p600_p5 }
  0x15   :  { %610 = shalt.err (!%p607_p9)
}
  0x16   :  { %28 = dma.hbm_to_vmem [thread:$0]  %s760_s1, 1024, %s23_s27, [#allocation3], %s659_s29, %s659_s29, %s660_s30  }
  0x17   :  { %s661_s13 = smov [#allocation7]  }
  0x18   :  { %s50_s14 = sshll.u32 %s661_s13, 4  ;;  %s51_s14 = int_to_ptr.vmem [resolvable:$true] %s50_s14 }
  0x19   :  { %s619_s15 = scalar_lea.vmem %s51_s14, 1024  ;;  %p624_p11 = scmp.lt.s32.totalorder %s51_s14, %s51_s14 }
  0x1a   :  { %p620_p10 = scmp.ne.s32.totalorder %s51_s14, %s619_s15  ;;  %p625_p12 = scmp.lt.s32.totalorder %s619_s15, %s619_s15 }
  0x1c   :  { %p626_p13 = por %p625_p12, %p624_p11 }
  0x1e   :  { %p627_p0 = pnand %p626_p13, %p620_p10 }
  0x20   :  { %630 = shalt.err (!%p627_p0)
}
  0x21   :  { %56 = dma.hbm_to_vmem [thread:$0]  %s764_s5, 1024, %s51_s14, [#allocation6], %s659_s29, %s659_s29, %s660_s30  }
  0x22   :  { %651 = dma.done.wait [#allocation3], 1024  }
  0x23   :  { %652 = vsyncadd [#allocation3], 4294966272 }
  0x24   :  { %653 = dma.done.wait [#allocation6], 2048  }
  0x25   :  { %654 = vsyncadd [#allocation6], 4294965248  ;;  %v662_v0 = vmov 0.0   ;;  %vm663_vm0 = vmmov 0   ;;  %v547_v1 = vld [vmem:[#allocation2 + $0x38] sm:$0xff]   ;;  %v548_v2 = vld [vmem:[#allocation2 + $0x30] sm:$0xff]  }
  0x26   :  { %479 = vmatprep.subr.bf16.mxu0 %v662_v0  ;;  %495 = vmatprep.mubr.msk.bf16.mxu0 %vm663_vm0, %v662_v0  ;;  %v549_v3 = vld [vmem:[#allocation2 + $0x28] sm:$0xff]   ;;  %v555_v4 = vld [vmem:[#allocation5 + $0x38] sm:$0xff]   ;;  %v550_v5 = vld [vmem:[#allocation2 + $0x20] sm:$0xff]   ;;  %s664_s21 = smov [#allocation8]  }
  0x27   :  { %499 = vmatprep.subr.bf16.mxu1 %v662_v0  ;;  %515 = vmatprep.mubr.msk.bf16.mxu1 %vm663_vm0, %v662_v0  ;;  %v556_v6 = vld [vmem:[#allocation5 + $0x30] sm:$0xff]   ;;  %v551_v7 = vld [vmem:[#allocation2 + $0x18] sm:$0xff]   ;;  %v557_v8 = vld [vmem:[#allocation5 + $0x28] sm:$0xff]   ;;  %s415_s22 = sshll.u32 %s664_s21, 4  ;;  %s416_s22 = int_to_ptr.vmem [resolvable:$true] %s415_s22 }
  0x28   :  { %480 = vmatpush3.bf16.msra.mxu0 %v547_v1  ;;  %500 = vmatpush3.bf16.msra.mxu1 %v555_v4  ;;  %v552_v9 = vld [vmem:[#allocation2 + $0x10] sm:$0xff]   ;;  %v558_v10 = vld [vmem:[#allocation5 + $0x20] sm:$0xff]   ;;  %v553_v11 = vld [vmem:[#allocation2 + $0x8] sm:$0xff]   ;;  %p636_p2 = scmp.lt.s32.totalorder %s416_s22, %s416_s22 }
  0x29   :  { %481 = vmatprep.subr.bf16.mxu0 %v662_v0  ;;  %501 = vmatprep.subr.bf16.mxu1 %v662_v0  ;;  %v559_v12 = vld [vmem:[#allocation5 + $0x18] sm:$0xff]   ;;  %v554_v13 = vld [vmem:[#allocation2] sm:$0xff]   ;;  %v560_v15 = vld [vmem:[#allocation5 + $0x10] sm:$0xff]  }
  0x2a   :  { %v69_v14 = vld [vmem:[%s759_s0] sm:$0xff]  ;;  %v561_v17 = vld [vmem:[#allocation5 + $0x8] sm:$0xff]   ;;  %v563_v19 = vld [vmem:[#allocation7 + $0x38] sm:$0xff]  }
  0x2b   :  { %v70_v16 = vpack.c.bf16 %v69_v14, %v69_v14  ;;  %v562_v18 = vld [vmem:[#allocation5] sm:$0xff]   ;;  %v564_v20 = vld [vmem:[#allocation7 + $0x30] sm:$0xff]   ;;  %v565_v21 = vld [vmem:[#allocation7 + $0x28] sm:$0xff]  }
  0x2c   :  { %482 = vmatpush3.bf16.msra.mxu0 %v548_v2  ;;  %502 = vmatpush3.bf16.msra.mxu1 %v556_v6  ;;  %v566_v22 = vld [vmem:[#allocation7 + $0x20] sm:$0xff]   ;;  %v567_v23 = vld [vmem:[#allocation7 + $0x18] sm:$0xff]   ;;  %v568_v24 = vld [vmem:[#allocation7 + $0x10] sm:$0xff]  }
  0x2d   :  { %483 = vmatprep.subr.bf16.mxu0 %v662_v0  ;;  %503 = vmatprep.subr.bf16.mxu1 %v662_v0  ;;  %v425_v25 = vld [vmem:[%s761_s2] ss:$0 sm:$0xff]  ;;  %v569_v33 = vld [vmem:[#allocation7 + $0x8] sm:$0xff]  }
  0x2e   :  { %v570_v34 = vld [vmem:[#allocation7] sm:$0xff]  }
  0x2f   :  { %v434_v35 = vld [vmem:[%s763_s4] ss:$0 sm:$0xff]  ;;  %s631_s4 = scalar_lea.vmem %s416_s22, 128 }
  0x30   :  { %484 = vmatpush3.bf16.msra.mxu0 %v549_v3  ;;  %504 = vmatpush3.bf16.msra.mxu1 %v557_v8  ;;  %v443_v43 = vld [vmem:[%s765_s6] ss:$0 sm:$0xff]  ;;  %p632_p1 = scmp.ne.s32.totalorder %s416_s22, %s631_s4  ;;  %p637_p3 = scmp.lt.s32.totalorder %s631_s4, %s631_s4 }
  0x31   :  { %485 = vmatprep.subr.bf16.mxu0 %v662_v0  ;;  %505 = vmatprep.subr.bf16.mxu1 %v662_v0 }
  0x32   :  { %p638_p4 = por %p637_p3, %p636_p2 }
  0x34   :  { %486 = vmatpush3.bf16.msra.mxu0 %v550_v5  ;;  %506 = vmatpush3.bf16.msra.mxu1 %v558_v10  ;;  %p639_p5 = pnand %p638_p4, %p632_p1 }
  0x35   :  { %487 = vmatprep.subr.bf16.mxu0 %v662_v0  ;;  %507 = vmatprep.subr.bf16.mxu1 %v662_v0 }
  0x38   :  { %488 = vmatpush3.bf16.msra.mxu0 %v551_v7  ;;  %508 = vmatpush3.bf16.msra.mxu1 %v559_v12 }
  0x39   :  { %489 = vmatprep.subr.bf16.mxu0 %v662_v0  ;;  %509 = vmatprep.subr.bf16.mxu1 %v662_v0 }
  0x3c   :  { %490 = vmatpush3.bf16.msra.mxu0 %v552_v9  ;;  %510 = vmatpush3.bf16.msra.mxu1 %v560_v15 }
  0x3d   :  { %491 = vmatprep.subr.bf16.mxu0 %v662_v0  ;;  %511 = vmatprep.subr.bf16.mxu1 %v662_v0 }
  0x40   :  { %492 = vmatpush3.bf16.msra.mxu0 %v553_v11  ;;  %512 = vmatpush3.bf16.msra.mxu1 %v561_v17 }
  0x41   :  { %493 = vmatprep.subr.bf16.mxu0 %v662_v0  ;;  %513 = vmatprep.subr.bf16.mxu1 %v662_v0 }
  0x44   :  { %494 = vmatpush3.bf16.msra.mxu0 %v554_v13  ;;  %514 = vmatpush3.bf16.msra.mxu1 %v562_v18 }
  0x45   :  { %519 = vmatprep.subr.bf16.mxu0 %v662_v0 }
  0x47   :  { %496 = vmatmul.mubr.bf16.vlgmr.msra.gmra.mxu0 %v70_v16 }
  0x48   :  { %535 = vmatprep.mubr.msk.bf16.mxu0 %vm663_vm0, %v662_v0  ;;  %520 = vmatpush3.bf16.msra.mxu0 %v563_v19 }
  0x49   :  { %521 = vmatprep.subr.bf16.mxu0 %v662_v0 }
  0x4c   :  { %522 = vmatpush3.bf16.msra.mxu0 %v564_v20 }
  0x4d   :  { %523 = vmatprep.subr.bf16.mxu0 %v662_v0 }
  0x50   :  { %524 = vmatpush3.bf16.msra.mxu0 %v565_v21 }
  0x51   :  { %525 = vmatprep.subr.bf16.mxu0 %v662_v0 }
  0x54   :  { %526 = vmatpush3.bf16.msra.mxu0 %v566_v22 }
  0x55   :  { %527 = vmatprep.subr.bf16.mxu0 %v662_v0 }
  0x58   :  { %528 = vmatpush3.bf16.msra.mxu0 %v567_v23 }
  0x59   :  { %529 = vmatprep.subr.bf16.mxu0 %v662_v0 }
  0x5c   :  { %530 = vmatpush3.bf16.msra.mxu0 %v568_v24 }
  0x5d   :  { %531 = vmatprep.subr.bf16.mxu0 %v662_v0 }
  0x60   :  { %532 = vmatpush3.bf16.msra.mxu0 %v569_v33 }
  0x61   :  { %533 = vmatprep.subr.bf16.mxu0 %v662_v0 }
  0x64   :  { %534 = vmatpush3.bf16.msra.mxu0 %v570_v34 }
 0x107   :  { %v176_v26 = vpop.f32.mrf.mxu0 }
 0x108   :  { %v177_v27 = vadd.f32 %v425_v25, %v176_v26 }
 0x109   :  { %v497_v28 = vpop.f32.mrf.mxu0 }
 0x10a   :  { %v182_v29 = vmax.f32 %v177_v27, 0.0 }
 0x10b   :  { %v179_v30 = vpop.f32.mrf.mxu0 }
 0x10c   :  { %v183_v31 = vpack.c.bf16 %v182_v29, %v182_v29 }
 0x10d   :  { %v498_v32 = vpop.f32.mrf.mxu0 }
 0x10e   :  { %516 = vmatmul.mubr.bf16.vlgmr.msra.gmra.mxu1 %v183_v31 }
 0x1ce   :  { %v289_v36 = vpop.f32.mrf.mxu1 }
 0x1cf   :  { %v290_v37 = vadd.f32 %v434_v35, %v289_v36 }
 0x1d0   :  { %v517_v38 = vpop.f32.mrf.mxu1 }
 0x1d1   :  { %v295_v39 = vmax.f32 %v290_v37, 0.0 }
 0x1d2   :  { %v292_v40 = vpop.f32.mrf.mxu1 }
 0x1d3   :  { %v296_v41 = vpack.c.bf16 %v295_v39, %v295_v39 }
 0x1d4   :  { %v518_v42 = vpop.f32.mrf.mxu1 }
 0x1d5   :  { %536 = vmatmul.mubr.bf16.vlgmr.msra.gmra.mxu0 %v296_v41 }
 0x295   :  { %v402_v44 = vpop.f32.mrf.mxu0 }
 0x296   :  { %v403_v45 = vadd.f32 %v443_v43, %v402_v44 }
 0x297   :  { %v537_v46 = vpop.f32.mrf.mxu0 }
 0x298   :  { %408 = vst [vmem:[#allocation8] sm:$0xff] %v403_v45 }
 0x299   :  { %v405_v47 = vpop.f32.mrf.mxu0 }
 0x29a   :  { %642 = shalt.err (!%p639_p5)
}
 0x29b   :  { %418 = dma.vmem_to_hbm [thread:$0]  %s416_s22, 128, %s766_s7, [#allocation4]   ;;  %v538_v48 = vpop.f32.mrf.mxu0 }
 0x29c   :  { %655 = dma.done.wait [#allocation4], 128  }
 0x29d   :  { %656 = vsyncadd [#allocation4], 4294967168 }
 0x29e   :  { %422 = vsyncpa [#allocation3], 1 }
 0x29f   :  { %423 = vsyncpa [#allocation6], 1 }
 0x2a0   :  { %424 = vsyncpa [#allocation4], 1 }

</bundles_post_ra>
